<compile_context>
chip_gen: v7x
topology: tpu7x:2x2x1
jax: 0.10.0
libtpu: 0.0.40
codegen_flags: <defaults>
</compile_context>

<pallas_src>
import jax
import jax.numpy as jnp
from jax.experimental import pallas as pl
from jax.experimental.pallas import tpu as pltpu


def moe_adaptor_kernel(x_ref, wgate_ref, wcat_ref, cmat_ref, out_ref):
    # x_ref:     (tm, D_in)        input rows (native dtype)
    # wgate_ref: (D_in, E)         gating weights
    # wcat_ref:  (D_in, E*D_out)   concatenated expert weights
    # cmat_ref:  (E, D_out)        precomputed bias_e @ W_e
    # out_ref:   (tm, D_out)
    x = x_ref[...]                                               # no upcast

    # --- gating: softmax(x @ w_gate) in f32 ---
    logits = jnp.dot(x, wgate_ref[...],
                     preferred_element_type=jnp.float32)         # (tm, E)
    logits = logits - jnp.max(logits, axis=-1, keepdims=True)
    exp_l = jnp.exp(logits)
    gates = exp_l * pl.reciprocal(
        jnp.sum(exp_l, axis=-1, keepdims=True), approx=True)     # (tm, E)

    # --- all experts in one wide MXU matmul ---
    res = jnp.dot(x, wcat_ref[...],
                  preferred_element_type=jnp.float32)            # (tm, E*D_out)

    d_out = out_ref.shape[-1]
    n_exps = cmat_ref.shape[0]

    # Gated reduction over experts (E is small & static -> unrolled slices;
    # the lane extractions ride the otherwise-idle XLU slot).
    acc = gates[:, 0:1] * res[:, 0:d_out]
    for e in range(1, n_exps):
        acc = acc + gates[:, e:e + 1] * res[:, e * d_out:(e + 1) * d_out]

    # bias correction:  sum_e gates[:, e] * (bias_e @ W_e)  ==  gates @ c_mat
    corr = jnp.dot(gates, cmat_ref[...].astype(jnp.float32),
                   preferred_element_type=jnp.float32)           # (tm, D_out)

    out_ref[...] = (acc - corr).astype(out_ref.dtype)


def moe_adaptor_forward(x, w_gate, biases, weights, *, tm=1024):
    """x: (..., D_in); w_gate: (D_in, E); biases: (E, D_in); weights: (E, D_in, D_out)."""
    lead_shape = x.shape[:-1]
    d_in = x.shape[-1]
    n_exps, _, d_out = weights.shape

    x2 = x.reshape(-1, d_in)
    b = x2.shape[0]

    # Row tile: multiple of 8 (f32 sublanes), large enough to amortize the
    # per-grid-step overhead, clamped so tiny inputs use a single small tile.
    tm = max(8, min(tm, pl.cdiv(b, 8) * 8))
    grid = (pl.cdiv(b, tm),)   # last tile may be partial; Pallas masks it

    # Fold the per-expert bias into a tiny (E, D_out) constant:
    #   (x - bias_e) @ W_e = x @ W_e - bias_e @ W_e
    c_mat = jnp.einsum("ei,eio->eo", biases, weights)            # (E, D_out)
    # Concatenate expert weights along the output dim -> one wide matmul.
    w_cat = jnp.transpose(weights, (1, 0, 2)).reshape(d_in, n_exps * d_out)

    out = pl.pallas_call(
        moe_adaptor_kernel,
        out_shape=jax.ShapeDtypeStruct((b, d_out), x.dtype),
        grid_spec=pltpu.PrefetchScalarGridSpec(
            num_scalar_prefetch=0,
            grid=grid,
            in_specs=[
                pl.BlockSpec((tm, d_in), lambda i: (i, 0)),
                pl.BlockSpec((d_in, n_exps), lambda i: (0, 0)),          # invariant
                pl.BlockSpec((d_in, n_exps * d_out), lambda i: (0, 0)),  # invariant
                pl.BlockSpec((n_exps, d_out), lambda i: (0, 0)),         # invariant
            ],
            out_specs=pl.BlockSpec((tm, d_out), lambda i: (i, 0)),
        ),
        compiler_params=pltpu.CompilerParams(
            dimension_semantics=("parallel",),
            vmem_limit_bytes=64 * 1024 * 1024),
    )(x2, w_gate, w_cat, c_mat)

    return out.reshape(*lead_shape, d_out)


def reference_forward(x, w_gate, biases, weights):
    """Pure-JAX reference mirroring the PyTorch module (eval mode)."""
    logits = x @ w_gate
    gates = jax.nn.softmax(logits, axis=-1)                      # (..., E)
    xe = x[..., None, :] - biases                                # (..., E, D_in)
    expert_out = jnp.einsum("...ei,eio->...eo", xe, weights)     # (..., E, D_out)
    return jnp.sum(gates[..., None] * expert_out, axis=-2)


if __name__ == "__main__":
    key = jax.random.PRNGKey(0)

    # Module config: MoEAdaptorLayer(n_exps=4, layers=[32, 16])
    n_exps, d_in, d_out = 4, 32, 16
    batch, seq = 2, 8

    k_x, k_w, k_g, k_b = jax.random.split(key, 4)
    x = jax.random.normal(k_x, (batch, seq, d_in), dtype=jnp.float32)

    # Nonzero gate / bias params so the gating softmax and the bias-folding
    # path are actually exercised (PyTorch inits them to zero, which is a
    # degenerate check). Expert weights ~ N(0, 0.02) as in PWLayer init.
    w_gate = 0.5 * jax.random.normal(k_g, (d_in, n_exps), dtype=jnp.float32)
    biases = 0.5 * jax.random.normal(k_b, (n_exps, d_in), dtype=jnp.float32)
    weights = 0.02 * jax.random.normal(k_w, (n_exps, d_in, d_out), dtype=jnp.float32)

    out = moe_adaptor_forward(x, w_gate, biases, weights)
    out = jax.block_until_ready(out)

    ref = reference_forward(x, w_gate, biases, weights)
    assert out.shape == (batch, seq, d_out)
    max_err = float(jnp.max(jnp.abs(out - ref)))
    # Tolerance accounts for MXU default (bf16-pass) precision vs the f32 reference.
    assert jnp.allclose(out, ref, atol=2e-3, rtol=2e-2), \
        f"mismatch vs reference (max abs err {max_err})"

    print("KERNEL_OK")
</pallas_src>

<mosaic_0001>
module attributes {stable_mosaic.version = 11 : i64} {
  func.func @moe_adaptor_kernel(%arg0: i32, %arg1: memref<16x32xf32, #tpu.memory_space<vmem>>, %arg2: memref<32x4xf32, #tpu.memory_space<vmem>>, %arg3: memref<32x64xf32, #tpu.memory_space<vmem>>, %arg4: memref<4x16xf32, #tpu.memory_space<vmem>>, %arg5: memref<16x16xf32, #tpu.memory_space<vmem>>) attributes {dimension_semantics = [#tpu.dimension_semantics<parallel>], iteration_bounds = array<i64: 1>, scalar_prefetch = 0 : i64, scratch_operands = 0 : i64, tpu.core_type = #tpu.core_type<tc>, window_params = [{transform_indices = @transform_0, window_bounds = array<i64: 16, 32>}, {pipeline_mode = #tpu.pipeline_mode<synchronous>, transform_indices = @transform_1, window_bounds = array<i64: 32, 4>}, {pipeline_mode = #tpu.pipeline_mode<synchronous>, transform_indices = @transform_2, window_bounds = array<i64: 32, 64>}, {pipeline_mode = #tpu.pipeline_mode<synchronous>, transform_indices = @transform_3, window_bounds = array<i64: 4, 16>}, {transform_indices = @transform_4, window_bounds = array<i64: 16, 16>}]} {
    %c0 = arith.constant 0 : index
    %c0_0 = arith.constant 0 : index
    %0 = vector.load %arg1[%c0, %c0_0] : memref<16x32xf32, #tpu.memory_space<vmem>>, vector<16x32xf32>
    %c0_1 = arith.constant 0 : index
    %c0_2 = arith.constant 0 : index
    %1 = vector.load %arg2[%c0_1, %c0_2] : memref<32x4xf32, #tpu.memory_space<vmem>>, vector<32x4xf32>
    %cst = arith.constant dense<0.000000e+00> : vector<16x4xf32>
    %2 = tpu.matmul %0, %1, %cst {dimension_numbers = #tpu.dot_dimension_numbers<[1], [0], [0], [1], [0, 0, 1, 1], [], []>} : vector<16x32xf32>, vector<32x4xf32>, vector<16x4xf32> -> vector<16x4xf32>
    %cst_3 = arith.constant dense<0xFF800000> : vector<16xf32>
    %3 = vector.multi_reduction <maximumf>, %2, %cst_3 [1] : vector<16x4xf32> to vector<16xf32>
    %4 = vector.shape_cast %3 : vector<16xf32> to vector<16x1xf32>
    %5 = vector.broadcast %4 : vector<16x1xf32> to vector<16x4xf32>
    %6 = arith.subf %2, %5 : vector<16x4xf32>
    %7 = math.exp %6 : vector<16x4xf32>
    %cst_4 = arith.constant dense<0.000000e+00> : vector<16xf32>
    %8 = vector.multi_reduction <add>, %7, %cst_4 [1] : vector<16x4xf32> to vector<16xf32>
    %9 = vector.shape_cast %8 : vector<16xf32> to vector<16x1xf32>
    %10 = tpu.reciprocal %9 {approx = true} : vector<16x1xf32> -> vector<16x1xf32>
    %11 = vector.broadcast %10 : vector<16x1xf32> to vector<16x4xf32>
    %12 = arith.mulf %7, %11 : vector<16x4xf32>
    %c0_5 = arith.constant 0 : index
    %c0_6 = arith.constant 0 : index
    %13 = vector.load %arg3[%c0_5, %c0_6] : memref<32x64xf32, #tpu.memory_space<vmem>>, vector<32x64xf32>
    %cst_7 = arith.constant dense<0.000000e+00> : vector<16x64xf32>
    %14 = tpu.matmul %0, %13, %cst_7 {dimension_numbers = #tpu.dot_dimension_numbers<[1], [0], [0], [1], [0, 0, 1, 1], [], []>} : vector<16x32xf32>, vector<32x64xf32>, vector<16x64xf32> -> vector<16x64xf32>
    %15 = vector.extract_strided_slice %12 {offsets = [0, 0], sizes = [16, 1], strides = [1, 1]} : vector<16x4xf32> to vector<16x1xf32>
    %16 = vector.extract_strided_slice %14 {offsets = [0, 0], sizes = [16, 16], strides = [1, 1]} : vector<16x64xf32> to vector<16x16xf32>
    %17 = vector.broadcast %15 : vector<16x1xf32> to vector<16x16xf32>
    %18 = arith.mulf %17, %16 : vector<16x16xf32>
    %19 = vector.extract_strided_slice %12 {offsets = [0, 1], sizes = [16, 1], strides = [1, 1]} : vector<16x4xf32> to vector<16x1xf32>
    %20 = vector.extract_strided_slice %14 {offsets = [0, 16], sizes = [16, 16], strides = [1, 1]} : vector<16x64xf32> to vector<16x16xf32>
    %21 = vector.broadcast %19 : vector<16x1xf32> to vector<16x16xf32>
    %22 = arith.mulf %21, %20 : vector<16x16xf32>
    %23 = arith.addf %18, %22 : vector<16x16xf32>
    %24 = vector.extract_strided_slice %12 {offsets = [0, 2], sizes = [16, 1], strides = [1, 1]} : vector<16x4xf32> to vector<16x1xf32>
    %25 = vector.extract_strided_slice %14 {offsets = [0, 32], sizes = [16, 16], strides = [1, 1]} : vector<16x64xf32> to vector<16x16xf32>
    %26 = vector.broadcast %24 : vector<16x1xf32> to vector<16x16xf32>
    %27 = arith.mulf %26, %25 : vector<16x16xf32>
    %28 = arith.addf %23, %27 : vector<16x16xf32>
    %29 = vector.extract_strided_slice %12 {offsets = [0, 3], sizes = [16, 1], strides = [1, 1]} : vector<16x4xf32> to vector<16x1xf32>
    %30 = vector.extract_strided_slice %14 {offsets = [0, 48], sizes = [16, 16], strides = [1, 1]} : vector<16x64xf32> to vector<16x16xf32>
    %31 = vector.broadcast %29 : vector<16x1xf32> to vector<16x16xf32>
    %32 = arith.mulf %31, %30 : vector<16x16xf32>
    %33 = arith.addf %28, %32 : vector<16x16xf32>
    %c0_8 = arith.constant 0 : index
    %c0_9 = arith.constant 0 : index
    %34 = vector.load %arg4[%c0_8, %c0_9] : memref<4x16xf32, #tpu.memory_space<vmem>>, vector<4x16xf32>
    %cst_10 = arith.constant dense<0.000000e+00> : vector<16x16xf32>
    %35 = tpu.matmul %12, %34, %cst_10 {dimension_numbers = #tpu.dot_dimension_numbers<[1], [0], [0], [1], [0, 0, 1, 1], [], []>} : vector<16x4xf32>, vector<4x16xf32>, vector<16x16xf32> -> vector<16x16xf32>
    %36 = arith.subf %33, %35 : vector<16x16xf32>
    %c0_11 = arith.constant 0 : index
    %c0_12 = arith.constant 0 : index
    %37 = vector.load %arg5[%c0_11, %c0_12] : memref<16x16xf32, #tpu.memory_space<vmem>>, vector<16x16xf32>
    tpu.vector_store %arg5[%c0_11, %c0_12], %36 {strides = array<i32>} : memref<16x16xf32, #tpu.memory_space<vmem>>, vector<16x16xf32>,
    return
  }
  func.func @transform_0(%arg0: i32) -> (i32, i32) {
    %c0_i32 = arith.constant 0 : i32
    %c0_i32_0 = arith.constant 0 : i32
    return %arg0, %c0_i32 : i32, i32
  }
  func.func @transform_1(%arg0: i32) -> (i32, i32) {
    %c0_i32 = arith.constant 0 : i32
    %c0_i32_0 = arith.constant 0 : i32
    %c0_i32_1 = arith.constant 0 : i32
    return %c0_i32, %c0_i32_0 : i32, i32
  }
  func.func @transform_2(%arg0: i32) -> (i32, i32) {
    %c0_i32 = arith.constant 0 : i32
    %c0_i32_0 = arith.constant 0 : i32
    %c0_i32_1 = arith.constant 0 : i32
    return %c0_i32, %c0_i32_0 : i32, i32
  }
  func.func @transform_3(%arg0: i32) -> (i32, i32) {
    %c0_i32 = arith.constant 0 : i32
    %c0_i32_0 = arith.constant 0 : i32
    %c0_i32_1 = arith.constant 0 : i32
    return %c0_i32, %c0_i32_0 : i32, i32
  }
  func.func @transform_4(%arg0: i32) -> (i32, i32) {
    %c0_i32 = arith.constant 0 : i32
    %c0_i32_0 = arith.constant 0 : i32
    return %arg0, %c0_i32 : i32, i32
  }
}

</mosaic_0001>

<bundles_post_ra>
// kernel: tpu_custom_call.1
= control target key start
LH: loop header
LB: loop body
LE: loop exit
PB: predicated region body
PF: predicated region fallthrough
CT: control target
= control target key end

     0   :  { %9 = vsyncpa [#allocation3], 0  ;;  %s780_s0 = inlined_call_operand.hbm [shape: f32[16,32], index: 0, kind: input, shape index: {}]   ;;  %s781_s1 = inlined_call_operand.hbm [shape: f32[32,4], index: 1, kind: input, shape index: {}]   ;;  %s782_s2 = inlined_call_operand.hbm [shape: f32[32,64], index: 2, kind: input, shape index: {}]   ;;  %s783_s3 = inlined_call_operand.hbm [shape: f32[4,16], index: 3, kind: input, shape index: {}]   ;;  %s784_s4 = inlined_call_operand.hbm [shape: f32[16,16], index: 4, kind: output, shape index: {}]  }
   0x1   :  { %10 = vsyncpa [#allocation6], 0 }
   0x2   :  { %11 = vsyncpa [#allocation9], 0 }
   0x3   :  { %12 = vsyncpa [#allocation4], 0  ;;  %s652_s15 = smov [#allocation5]   ;;  %s653_s17 = smov [#allocation2]  }
   0x4   :  { %s30_s16 = sshll.u32 %s652_s15, 4  ;;  %s18_s18 = sshll.u32 %s653_s17, 4  ;;  %s31_s16 = int_to_ptr.vmem [resolvable:$true] %s30_s16  ;;  %s691_s18 = int_to_ptr.vmem [resolvable:$true] %s18_s18 }
   0x5   :  { %s534_s21 = scalar_lea.hbm %s781_s1, 512 }
   0x6   :  { %p535_p0 = scmp.ne.s32.totalorder %s781_s1, %s534_s21  ;;  %p538_p1 = scmp.lt.u32.totalorder %s534_s21, %s781_s1 }
   0x8   :  { %p540_p2 = pnand %p538_p1, %p535_p0 }
   0xa   :  { %543 = shalt.err (!%p540_p2)
}
   0xb   :  { %s544_s26 = scalar_lea.vmem %s31_s16, 512  ;;  %p549_p4 = scmp.lt.s32.totalorder %s31_s16, %s31_s16 }
   0xc   :  { %p545_p3 = scmp.ne.s32.totalorder %s31_s16, %s544_s26  ;;  %p550_p5 = scmp.lt.s32.totalorder %s544_s26, %s544_s26 }
   0xe   :  { %p551_p6 = por %p550_p5, %p549_p4 }
  0x10   :  { %p552_p7 = pnand %p551_p6, %p545_p3 }
  0x12   :  { %555 = shalt.err (!%p552_p7)
}
  0x13   :  { %s654_s27 = smov 128   ;;  %s655_s28 = smov 8  }
  0x14   :  { %36 = dma.hbm_to_vmem [thread:$0]  %s781_s1, 512, %s31_s16, [#allocation6], %s654_s27, %s654_s27, %s655_s28  }
  0x15   :  { %s556_s7 = scalar_lea.hbm %s780_s0, 256 }
  0x16   :  { %p557_p8 = scmp.ne.s32.totalorder %s780_s0, %s556_s7  ;;  %p560_p9 = scmp.lt.u32.totalorder %s556_s7, %s780_s0 }
  0x18   :  { %p562_p10 = pnand %p560_p9, %p557_p8 }
  0x1a   :  { %565 = shalt.err (!%p562_p10)
}
  0x1b   :  { %s566_s12 = scalar_lea.vmem %s691_s18, 256  ;;  %p571_p12 = scmp.lt.s32.totalorder %s691_s18, %s691_s18 }
  0x1c   :  { %p567_p11 = scmp.ne.s32.totalorder %s691_s18, %s566_s12  ;;  %p572_p13 = scmp.lt.s32.totalorder %s566_s12, %s566_s12 }
  0x1e   :  { %p573_p0 = por %p572_p13, %p571_p12 }
  0x20   :  { %p574_p1 = pnand %p573_p0, %p567_p11 }
  0x22   :  { %577 = shalt.err (!%p574_p1)
}
  0x23   :  { %24 = dma.hbm_to_vmem [thread:$0]  %s780_s0, 256, %s691_s18, [#allocation3], %s654_s27, %s654_s27, %s655_s28  }
  0x24   :  { %s656_s14 = smov [#allocation7]   ;;  %s657_s16 = smov [#allocation8]  }
  0x25   :  { %s42_s15 = sshll.u32 %s656_s14, 4  ;;  %s55_s17 = sshll.u32 %s657_s16, 4  ;;  %s43_s15 = int_to_ptr.vmem [resolvable:$true] %s42_s15  ;;  %s56_s17 = int_to_ptr.vmem [resolvable:$true] %s55_s17 }
  0x26   :  { %s578_s21 = scalar_lea.hbm %s782_s2, 512 }
  0x27   :  { %p579_p2 = scmp.ne.s32.totalorder %s782_s2, %s578_s21  ;;  %p582_p3 = scmp.lt.u32.totalorder %s578_s21, %s782_s2 }
  0x29   :  { %p584_p4 = pnand %p582_p3, %p579_p2 }
  0x2b   :  { %587 = shalt.err (!%p584_p4)
}
  0x2c   :  { %s588_s0 = scalar_lea.vmem %s43_s15, 512  ;;  %p593_p6 = scmp.lt.s32.totalorder %s43_s15, %s43_s15 }
  0x2d   :  { %p589_p5 = scmp.ne.s32.totalorder %s43_s15, %s588_s0  ;;  %p594_p7 = scmp.lt.s32.totalorder %s588_s0, %s588_s0 }
  0x2f   :  { %p595_p8 = por %p594_p7, %p593_p6 }
  0x31   :  { %p596_p9 = pnand %p595_p8, %p589_p5 }
  0x33   :  { %599 = shalt.err (!%p596_p9)
}
  0x34   :  { %48 = dma.hbm_to_vmem [thread:$0]  %s782_s2, 512, %s43_s15, [#allocation6], %s654_s27, %s654_s27, %s655_s28  }
  0x35   :  { %s600_s5 = scalar_lea.hbm %s783_s3, 64 }
  0x36   :  { %p601_p10 = scmp.ne.s32.totalorder %s783_s3, %s600_s5  ;;  %p604_p11 = scmp.lt.u32.totalorder %s600_s5, %s783_s3 }
  0x38   :  { %p606_p12 = pnand %p604_p11, %p601_p10 }
  0x3a   :  { %609 = shalt.err (!%p606_p12)
}
  0x3b   :  { %s610_s10 = scalar_lea.vmem %s56_s17, 64  ;;  %p615_p0 = scmp.lt.s32.totalorder %s56_s17, %s56_s17 }
  0x3c   :  { %p611_p13 = scmp.ne.s32.totalorder %s56_s17, %s610_s10  ;;  %p616_p1 = scmp.lt.s32.totalorder %s610_s10, %s610_s10 }
  0x3e   :  { %p617_p2 = por %p616_p1, %p615_p0 }
  0x40   :  { %p618_p3 = pnand %p617_p2, %p611_p13 }
  0x42   :  { %621 = shalt.err (!%p618_p3)
}
  0x43   :  { %58 = dma.hbm_to_vmem [thread:$0]  %s783_s3, 64, %s56_s17, [#allocation9]  }
  0x44   :  { %644 = dma.done.wait [#allocation3], 256  }
  0x45   :  { %645 = vsyncadd [#allocation3], 4294967040 }
  0x46   :  { %646 = dma.done.wait [#allocation6], 1024  }
  0x47   :  { %647 = vsyncadd [#allocation6], 4294966272 }
  0x48   :  { %648 = dma.done.wait [#allocation9], 64  }
  0x49   :  { %649 = vsyncadd [#allocation9], 4294967232  ;;  %vm77_vm0 = vcmask 261120   ;;  %v73_v0 = vld [vmem:[#allocation5] sm:$0xff]  ;;  %v74_v1 = vld [vmem:[#allocation5 + $0x8] sm:$0xff]  ;;  %vm159_vm1 = vcmask 31744  }
  0x4a   :  { %v75_v2 = vld [vmem:[#allocation5 + $0x10] sm:$0xff]  ;;  %v490_v3 = vpack.c.bf16 %v74_v1, %v73_v0  ;;  %v76_v4 = vld [vmem:[#allocation5 + $0x18] sm:$0xff]  ;;  %v182_v12 = vld [vmem:[#allocation7] sm:$0xff]  ;;  %v658_v28 = vmov 1   ;;  %vm338_vm2 = vcmask 1043456   ;;  %v659_v38 = vmov 3  }
  0x4b   :  { %v71_v5 = vld [vmem:[#allocation2] sm:$0xff]  ;;  %v494_v6 = vpack.c.bf16 %v76_v4, %v75_v2  ;;  %v72_v7 = vld [vmem:[#allocation2 + $0x8] sm:$0xff]  ;;  %v183_v13 = vld [vmem:[#allocation7 + $0x8] sm:$0xff]  ;;  %520 = vset.pattern.permute.xlu0 %v658_v28  ;;  %521 = vset.pattern.permute.xlu1 %v658_v28  ;;  %v660_v39 = vmov 2   ;;  %v661_v40 = vmov 0   ;;  %s662_s3 = smov 112  }
  0x4c   :  { %471 = vmatprep.mubr.msk.f32.mxu0 %vm77_vm0, %v71_v5  ;;  %482 = vmatprep.mubr.msk.f32.mxu1 %vm77_vm0, %v71_v5  ;;  %v184_v14 = vld [vmem:[#allocation7 + $0x10] sm:$0xff]  ;;  %v498_v15 = vpack.c.bf16 %v183_v13, %v182_v12  ;;  %v185_v16 = vld [vmem:[#allocation7 + $0x18] sm:$0xff]  ;;  %v333_v29 = vld [vmem:[#allocation8] sm:$0xf]  ;;  %s663_s12 = smov 96   ;;  %s664_s1 = smov 80  }
  0x4d   :  { %491 = vmatprep.subr.bf16.mxu0 %v490_v3  ;;  %v502_v17 = vpack.c.bf16 %v185_v16, %v184_v14  ;;  %vm419_vm3 = vcmask 130048   ;;  %s665_s13 = smov [#allocation10]  }
  0x4e   :  { %493 = vmatpush3.bf16.msra.mxu0 %v490_v3  ;;  %499 = vmatprep.subr.bf16.mxu1 %v498_v15  ;;  %s427_s14 = sshll.u32 %s665_s13, 4  ;;  %s428_s14 = int_to_ptr.vmem [resolvable:$true] %s427_s14 }
  0x4f   :  { %495 = vmatprep.subr.bf16.mxu0 %v494_v6  ;;  %501 = vmatpush3.bf16.msra.mxu1 %v498_v15  ;;  %s622_s15 = scalar_lea.vmem %s428_s14, 256  ;;  %p627_p5 = scmp.lt.s32.totalorder %s428_s14, %s428_s14 }
  0x50   :  { %503 = vmatprep.subr.bf16.mxu1 %v502_v17  ;;  %p623_p4 = scmp.ne.s32.totalorder %s428_s14, %s622_s15  ;;  %p628_p6 = scmp.lt.s32.totalorder %s622_s15, %s622_s15 }
  0x52   :  { %497 = vmatpush3.bf16.msra.mxu0 %v494_v6  ;;  %p629_p7 = por %p628_p6, %p627_p5 }
  0x53   :  { %505 = vmatpush3.bf16.msra.mxu1 %v502_v17  ;;  %485 = vmatprep.subr.msk.mxu0 %vm338_vm2, %v333_v29 }
  0x54   :  { %p630_p8 = pnand %p629_p7, %p623_p4 }
  0x55   :  { %472 = vmatmul.mubr.msk.f32.vlgmr.msra.gmra.mrb[0].mxu0 %vm77_vm0, %v72_v7 }
  0x56   :  { %483 = vmatmul.mubr.msk.f32.vlgmr.msra.gmra.mrb[0].mxu1 %vm77_vm0, %v72_v7  ;;  %486 = vmatpush3.msk.msra.mxu0 %vm338_vm2, %v333_v29 }
 0x128   :  { %v473_v8 = vpop.f32.mrb[0].mxu0 }
 0x129   :  { %v150_v9 = vpop.f32.mrb[1].mxu0  ;;  %v163_v11 = vsel %vm159_vm1, %v473_v8, -inf  ;;  %v484_v30 = vpop.f32.mrb[0].mxu1 }
 0x12a   :  { %v160_v10 = vsel %vm159_vm1, %v150_v9, -inf  ;;  %v252_v31 = vpop.f32.mrb[1].mxu1 }
 0x12b   :  { %161 = vmax.xlane.f32.xlu0 %v160_v10 }
 0x12f   :  { %164 = vmax.xlane.f32.xlu0 %v163_v11 }
 0x1b8   :  { %v162_v18 = vpop.xlane.xlu0 %161 }
 0x1b9   :  { %v166_v19 = vsub.f32 %v150_v9, %v162_v18 }
 0x1bb   :  { %v168_v20 = vmul.f32 1.442695, %v166_v19 }
 0x1bc   :  { %v165_v21 = vpop.xlane.xlu0 %164 }
 0x1bd   :  { %526 = vpow2.f32 %v168_v20  ;;  %v167_v22 = vsub.f32 %v473_v8, %v165_v21 }
 0x1bf   :  { %v170_v23 = vmul.f32 1.442695, %v167_v22 }
 0x1c1   :  { %528 = vpow2.f32 %v170_v23 }
 0x1c7   :  { %v527_v24 = vpop.eup %526 }
 0x1c8   :  { %v172_v25 = vsel %vm159_vm1, %v527_v24, 0.0 }
 0x1c9   :  { %173 = vadd.xlane.f32.xlu1 %v172_v25 }
 0x1cb   :  { %v529_v26 = vpop.eup %528 }
 0x1cc   :  { %v175_v27 = vsel %vm159_vm1, %v529_v26, 0.0 }
 0x1cd   :  { %176 = vadd.xlane.f32.xlu1 %v175_v27 }
 0x256   :  { %v174_v32 = vpop.xlane.xlu1 %173 }
 0x257   :  { %530 = vrcp.f32 %v174_v32 }
 0x25a   :  { %v177_v33 = vpop.xlane.xlu1 %176 }
 0x25b   :  { %532 = vrcp.f32 %v177_v33 }
 0x261   :  { %v531_v34 = vpop.eup %530 }
 0x262   :  { %v180_v35 = vmul.f32 %v531_v34, %v527_v24 }
 0x264   :  { %274 = vperm.xlu0 %520, %v180_v35   ;;  %487 = vmatprep.mubr.msk.f32.mxu0 %vm159_vm1, %v180_v35 }
 0x265   :  { %v533_v36 = vpop.eup %532 }
 0x266   :  { %v181_v37 = vmul.f32 %v533_v36, %v529_v26 }
 0x268   :  { %278 = vperm.xlu1 %521, %v181_v37   ;;  %488 = vmatmul.mubr.msk.f32.vlgmr.msra.gmra.mrb[2].mxu0 %vm159_vm1, %v181_v37 }
 0x269   :  { %525 = vset.pattern.permute.xlu0 %v659_v38 }
 0x26c   :  { %522 = vset.pattern.permute.xlu1 %v660_v39 }
 0x26d   :  { %298 = vperm.xlu1 %522, %v181_v37  }
 0x271   :  { %294 = vperm.xlu1 %522, %v180_v35  }
 0x275   :  { %523 = vset.pattern.permute.xlu1 %v659_v38 }
 0x276   :  { %314 = vperm.xlu1 %523, %v180_v35  }
 0x27a   :  { %318 = vperm.xlu1 %523, %v181_v37  }
 0x27e   :  { %524 = vset.pattern.permute.xlu1 %v661_v40 }
 0x27f   :  { %263 = vperm.xlu1 %524, %v180_v35  }
 0x283   :  { %268 = vperm.xlu1 %524, %v181_v37  }
 0x2e3   :  { %v275_v41 = vpop.permute.xlu0 %274 }
 0x2e4   :  { %v281_v42 = vmul.f32 %v275_v41, %v252_v31 }
 0x2e6   :  { %285 = vrot.lane.b32.xlu1 %v281_v42, %s662_s3 }
 0x2e7   :  { %v279_v43 = vpop.permute.xlu1 %278 }
 0x2e8   :  { %v282_v44 = vmul.f32 %v484_v30, %v279_v43 }
 0x2ea   :  { %287 = vrot.lane.b32.xlu0 %v282_v44, %s662_s3 }
 0x2ec   :  { %v299_v45 = vpop.permute.xlu1 %298 }
 0x2ed   :  { %v302_v46 = vmul.f32 %v484_v30, %v299_v45 }
 0x2ef   :  { %307 = vrot.lane.b32.xlu0 %v302_v46, %s663_s12 }
 0x2f0   :  { %v295_v47 = vpop.permute.xlu1 %294 }
 0x2f1   :  { %v301_v48 = vmul.f32 %v295_v47, %v252_v31 }
 0x2f3   :  { %305 = vrot.lane.b32.xlu1 %v301_v48, %s663_s12 }
 0x2f5   :  { %v315_v49 = vpop.permute.xlu1 %314 }
 0x2f6   :  { %v321_v50 = vmul.f32 %v315_v49, %v252_v31 }
 0x2f8   :  { %325 = vrot.lane.b32.xlu1 %v321_v50, %s664_s1 }
 0x2f9   :  { %v319_v51 = vpop.permute.xlu1 %318 }
 0x2fa   :  { %v322_v52 = vmul.f32 %v484_v30, %v319_v51 }
 0x2fc   :  { %327 = vrot.lane.b32.xlu0 %v322_v52, %s664_s1 }
 0x2fe   :  { %v264_v55 = vpop.permute.xlu1 %263 }
 0x2ff   :  { %v271_v59 = vmul.f32 %v264_v55, %v252_v31 }
 0x302   :  { %v269_v56 = vpop.permute.xlu1 %268 }
 0x303   :  { %v272_v62 = vmul.f32 %v484_v30, %v269_v56 }
 0x33b   :  { %v489_v53 = vpop.f32.mrb[2].mxu0 }
 0x33c   :  { %v408_v54 = vpop.f32.mrb[3].mxu0 }
 0x358   :  { %v286_v57 = vpop.permute.xlu1 %285 }
 0x359   :  { %v291_v61 = vadd.f32 %v286_v57, %v271_v59 }
 0x35c   :  { %v288_v58 = vpop.permute.xlu0 %287 }
 0x35d   :  { %v292_v2 = vadd.f32 %v288_v58, %v272_v62 }
 0x361   :  { %v308_v0 = vpop.permute.xlu0 %307 }
 0x362   :  { %v312_v4 = vadd.f32 %v308_v0, %v292_v2 }
 0x365   :  { %v306_v60 = vpop.permute.xlu1 %305 }
 0x366   :  { %v311_v63 = vadd.f32 %v306_v60, %v291_v61 }
 0x36a   :  { %v326_v1 = vpop.permute.xlu1 %325 }
 0x36b   :  { %v331_v3 = vadd.f32 %v326_v1, %v311_v63 }
 0x36d   :  { %v417_v5 = vsub.f32 %v331_v3, %v408_v54 }
 0x36e   :  { %v328_v6 = vpop.permute.xlu0 %327 }
 0x36f   :  { %v332_v7 = vadd.f32 %v328_v6, %v312_v4  ;;  %420 = vst.msk [vmem:[#allocation10] sm:$0xff] %vm419_vm3, %v417_v5 }
 0x371   :  { %v418_v8 = vsub.f32 %v332_v7, %v489_v53 }
 0x373   :  { %421 = vst.msk [vmem:[#allocation10 + $0x8] sm:$0xff] %vm419_vm3, %v418_v8 }
 0x374   :  { %633 = shalt.err (!%p630_p8)
}
 0x375   :  { %s634_s19 = scalar_lea.hbm %s784_s4, 256 }
 0x376   :  { %p635_p9 = scmp.ne.s32.totalorder %s784_s4, %s634_s19  ;;  %p638_p10 = scmp.lt.u32.totalorder %s634_s19, %s784_s4 }
 0x378   :  { %p640_p11 = pnand %p638_p10, %p635_p9 }
 0x37a   :  { %643 = shalt.err (!%p640_p11)
}
 0x37b   :  { %433 = dma.vmem_to_hbm [thread:$0]  %s428_s14, 256, %s784_s4, [#allocation4], %s654_s27, %s654_s27, %s655_s28  }
 0x37c   :  { %650 = dma.done.wait [#allocation4], 256  }
 0x37d   :  { %651 = vsyncadd [#allocation4], 4294967040 }
 0x37e   :  { %437 = vsyncpa [#allocation3], 1 }
 0x37f   :  { %438 = vsyncpa [#allocation6], 1 }
 0x380   :  { %439 = vsyncpa [#allocation9], 1 }
 0x381   :  { %440 = vsyncpa [#allocation4], 1 }

</bundles_post_ra>
